<compile_context>
chip_gen: v7x
topology: tpu7x:2x2x1
jax: 0.10.0
libtpu: 0.0.40
codegen_flags: <defaults>
</compile_context>

<pallas_src>
import math

import jax
import jax.numpy as jnp
from jax import lax
from jax.experimental import pallas as pl
from jax.experimental.pallas import tpu as pltpu

# ---------------- config (small, deterministic) ----------------
BATCH = 2
SEQ = 8
HIDDEN = 32
NUM_HEADS = 4
HEAD_DIM = HIDDEN // NUM_HEADS
INTERMEDIATE = 64
LN_EPS = 1e-12


def _layer_norm(x, gamma, beta):
    # x: (N, H); gamma/beta: (1, H). Biased variance (matches torch LayerNorm).
    mean = jnp.mean(x, axis=-1, keepdims=True)
    xc = x - mean
    var = jnp.mean(xc * xc, axis=-1, keepdims=True)
    inv = lax.rsqrt(var + LN_EPS)
    return xc * inv * gamma + beta


def _gelu_exact(x):
    # Exact (erf-based) GELU, matching torch.nn.functional.gelu default.
    return 0.5 * x * (1.0 + lax.erf(x * (1.0 / math.sqrt(2.0))))


def bert_layer_kernel(
    x_ref,      # (B*S, H)   flattened hidden states
    mask_ref,   # (B, S)     additive key mask
    wqkv_ref,   # (H, 3H)    fused Q/K/V weight
    bqkv_ref,   # (1, 3H)    fused Q/K/V bias
    wo_ref,     # (H, H)     attention output dense
    wi_ref,     # (H, I)     intermediate dense
    bi_ref,     # (1, I)
    wo2_ref,    # (I, H)     output dense
    vec_ref,    # (6, H): [b_attn_out, ln1_g, ln1_b, b_out, ln2_g, ln2_b]
    out_ref,    # (B*S, H)
):
    x = x_ref[...]                       # (B*S, H)
    mask = mask_ref[...]                 # (B, S)
    vecs = vec_ref[...]                  # (6, H)
    b_ao = vecs[0:1, :]
    g1 = vecs[1:2, :]
    b1 = vecs[2:3, :]
    b_o2 = vecs[3:4, :]
    g2 = vecs[4:5, :]
    b2 = vecs[5:6, :]

    # ---- fused Q/K/V projection: single MXU matmul over all B*S rows ----
    qkv = jnp.dot(x, wqkv_ref[...], preferred_element_type=jnp.float32) + bqkv_ref[...]
    q = qkv[:, 0:HIDDEN].reshape(BATCH, SEQ, HIDDEN)
    k = qkv[:, HIDDEN:2 * HIDDEN].reshape(BATCH, SEQ, HIDDEN)
    v = qkv[:, 2 * HIDDEN:3 * HIDDEN].reshape(BATCH, SEQ, HIDDEN)

    # ---- multi-head scaled dot-product attention ----
    # Batched einsums over B (no explicit transpose); static loop over heads.
    scale = 1.0 / math.sqrt(HEAD_DIM)
    add_mask = mask[:, None, :]          # (B, 1, S) broadcast over query rows
    ctx_parts = []
    for h in range(NUM_HEADS):
        lo = h * HEAD_DIM
        hi = lo + HEAD_DIM
        qh = q[:, :, lo:hi]              # (B, S, dH)
        kh = k[:, :, lo:hi]
        vh = v[:, :, lo:hi]
        scores = jnp.einsum(
            'bqd,bkd->bqk', qh, kh, preferred_element_type=jnp.float32) * scale
        scores = scores + add_mask
        m = jnp.max(scores, axis=-1, keepdims=True)
        e = jnp.exp(scores - m)
        denom = jnp.sum(e, axis=-1, keepdims=True)
        p = e * pl.reciprocal(denom, approx=True)   # EUP reciprocal, no VALU divide
        ctx_parts.append(jnp.einsum(
            'bqk,bkd->bqd', p, vh, preferred_element_type=jnp.float32))
    context = jnp.concatenate(ctx_parts, axis=-1).reshape(BATCH * SEQ, HIDDEN)

    # ---- BertSelfOutput: dense + residual + LayerNorm ----
    attn_out = jnp.dot(context, wo_ref[...], preferred_element_type=jnp.float32) + b_ao
    attn_out = _layer_norm(attn_out + x, g1, b1)

    # ---- BertIntermediate: dense + GELU ----
    inter = jnp.dot(attn_out, wi_ref[...], preferred_element_type=jnp.float32) + bi_ref[...]
    inter = _gelu_exact(inter)

    # ---- BertOutput: dense + residual + LayerNorm ----
    layer_out = jnp.dot(inter, wo2_ref[...], preferred_element_type=jnp.float32) + b_o2
    layer_out = _layer_norm(layer_out + attn_out, g2, b2)

    out_ref[...] = layer_out.astype(out_ref.dtype)


def bert_layer(hidden_states, attention_mask, params):
    B, S, H = hidden_states.shape
    x_flat = hidden_states.reshape(B * S, H)          # lane-dense 2-D slab
    mask2d = attention_mask.reshape(B, S)             # additive mask per key

    # Wrapper-side parameter packing (plain JAX, outside the kernel).
    w_qkv = jnp.concatenate([params["wq"], params["wk"], params["wv"]], axis=1)
    b_qkv = jnp.concatenate([params["bq"], params["bk"], params["bv"]], axis=1)
    vecs = jnp.concatenate(
        [params["bo"], params["ln1_g"], params["ln1_b"],
         params["bo2"], params["ln2_g"], params["ln2_b"]], axis=0)

    args = (x_flat, mask2d, w_qkv, b_qkv, params["wo"], params["wi"],
            params["bi"], params["wo2"], vecs)

    vmem_spec = pl.BlockSpec(memory_space=pltpu.MemorySpace.VMEM)
    out_flat = pl.pallas_call(
        bert_layer_kernel,
        out_shape=jax.ShapeDtypeStruct((B * S, H), jnp.float32),
        in_specs=[vmem_spec] * len(args),
        out_specs=vmem_spec,
    )(*args)
    return out_flat.reshape(B, S, H)


def init_params(key):
    ks = jax.random.split(key, 16)
    s = 0.02

    def w(k, shape):
        return jax.random.normal(k, shape, jnp.float32) * s

    return {
        # attention projections (stored as (in, out); equivalent to torch x @ W.T)
        "wq": w(ks[0], (HIDDEN, HIDDEN)), "bq": w(ks[1], (1, HIDDEN)),
        "wk": w(ks[2], (HIDDEN, HIDDEN)), "bk": w(ks[3], (1, HIDDEN)),
        "wv": w(ks[4], (HIDDEN, HIDDEN)), "bv": w(ks[5], (1, HIDDEN)),
        # BertSelfOutput
        "wo": w(ks[6], (HIDDEN, HIDDEN)), "bo": w(ks[7], (1, HIDDEN)),
        "ln1_g": jnp.ones((1, HIDDEN), jnp.float32),
        "ln1_b": jnp.zeros((1, HIDDEN), jnp.float32),
        # BertIntermediate
        "wi": w(ks[8], (HIDDEN, INTERMEDIATE)), "bi": w(ks[9], (1, INTERMEDIATE)),
        # BertOutput
        "wo2": w(ks[10], (INTERMEDIATE, HIDDEN)), "bo2": w(ks[11], (1, HIDDEN)),
        "ln2_g": jnp.ones((1, HIDDEN), jnp.float32),
        "ln2_b": jnp.zeros((1, HIDDEN), jnp.float32),
    }


def bert_layer_reference(hidden_states, attention_mask, params):
    """Pure-JAX reference matching the torch BertLayer forward (inference)."""
    B, S, H = hidden_states.shape
    x = hidden_states
    q = x @ params["wq"] + params["bq"]
    k = x @ params["wk"] + params["bk"]
    v = x @ params["wv"] + params["bv"]

    def split_heads(t):
        return t.reshape(B, S, NUM_HEADS, HEAD_DIM).transpose(0, 2, 1, 3)

    qh, kh, vh = split_heads(q), split_heads(k), split_heads(v)
    scores = jnp.einsum('bhqd,bhkd->bhqk', qh, kh) / math.sqrt(HEAD_DIM)
    scores = scores + attention_mask          # (B,1,1,S) broadcasts
    probs = jax.nn.softmax(scores, axis=-1)
    ctx = jnp.einsum('bhqk,bhkd->bhqd', probs, vh)
    ctx = ctx.transpose(0, 2, 1, 3).reshape(B, S, H)

    def ln(t, g, b):
        mu = jnp.mean(t, axis=-1, keepdims=True)
        var = jnp.mean((t - mu) ** 2, axis=-1, keepdims=True)
        return (t - mu) * lax.rsqrt(var + LN_EPS) * g + b

    attn_out = ln(ctx @ params["wo"] + params["bo"] + x,
                  params["ln1_g"], params["ln1_b"])
    inter = _gelu_exact(attn_out @ params["wi"] + params["bi"])
    return ln(inter @ params["wo2"] + params["bo2"] + attn_out,
              params["ln2_g"], params["ln2_b"])


if __name__ == "__main__":
    key = jax.random.PRNGKey(0)
    k_x, k_p = jax.random.split(key)

    hidden_states = jax.random.normal(k_x, (BATCH, SEQ, HIDDEN), jnp.float32)

    # Extended attention mask: all positions attendable except the last key of
    # the second batch element (masked with -10000), as in BERT.
    keep = jnp.ones((BATCH, SEQ), jnp.float32)
    keep = keep.at[1, -1].set(0.0)
    attention_mask = ((1.0 - keep) * -10000.0).reshape(BATCH, 1, 1, SEQ)

    params = init_params(k_p)

    layer_output = bert_layer(hidden_states, attention_mask, params)
    layer_output = jax.block_until_ready(layer_output)

    assert layer_output.shape == (BATCH, SEQ, HIDDEN)
    assert bool(jnp.all(jnp.isfinite(layer_output)))

    # Numerics check vs. pure-JAX reference (approx reciprocal in the softmax
    # introduces only ~1e-4-level relative deltas; tolerance is generous).
    ref = bert_layer_reference(hidden_states, attention_mask, params)
    assert bool(jnp.allclose(layer_output, ref, atol=1e-2, rtol=1e-2))

    # attention_probs dict from the torch module is empty when
    # config.visualization is False, so only layer_output is produced here.
    print("KERNEL_OK")
</pallas_src>

<mosaic_0001>
module attributes {stable_mosaic.version = 11 : i64} {
  func.func @bert_layer_kernel(%arg0: memref<16x32xf32, #tpu.memory_space<vmem>>, %arg1: memref<2x8xf32, #tpu.memory_space<vmem>>, %arg2: memref<32x96xf32, #tpu.memory_space<vmem>>, %arg3: memref<1x96xf32, #tpu.memory_space<vmem>>, %arg4: memref<32x32xf32, #tpu.memory_space<vmem>>, %arg5: memref<32x64xf32, #tpu.memory_space<vmem>>, %arg6: memref<1x64xf32, #tpu.memory_space<vmem>>, %arg7: memref<64x32xf32, #tpu.memory_space<vmem>>, %arg8: memref<6x32xf32, #tpu.memory_space<vmem>>, %arg9: memref<16x32xf32, #tpu.memory_space<vmem>>) attributes {dimension_semantics = [], scalar_prefetch = 0 : i64, scratch_operands = 0 : i64, tpu.core_type = #tpu.core_type<tc>} {
    %c0 = arith.constant 0 : index
    %c0_0 = arith.constant 0 : index
    %0 = vector.load %arg0[%c0, %c0_0] : memref<16x32xf32, #tpu.memory_space<vmem>>, vector<16x32xf32>
    %c0_1 = arith.constant 0 : index
    %c0_2 = arith.constant 0 : index
    %1 = vector.load %arg1[%c0_1, %c0_2] : memref<2x8xf32, #tpu.memory_space<vmem>>, vector<2x8xf32>
    %c0_3 = arith.constant 0 : index
    %c0_4 = arith.constant 0 : index
    %2 = vector.load %arg8[%c0_3, %c0_4] : memref<6x32xf32, #tpu.memory_space<vmem>>, vector<6x32xf32>
    %3 = vector.extract_strided_slice %2 {offsets = [0, 0], sizes = [1, 32], strides = [1, 1]} : vector<6x32xf32> to vector<1x32xf32>
    %4 = vector.extract_strided_slice %2 {offsets = [1, 0], sizes = [1, 32], strides = [1, 1]} : vector<6x32xf32> to vector<1x32xf32>
    %5 = vector.extract_strided_slice %2 {offsets = [2, 0], sizes = [1, 32], strides = [1, 1]} : vector<6x32xf32> to vector<1x32xf32>
    %6 = vector.extract_strided_slice %2 {offsets = [3, 0], sizes = [1, 32], strides = [1, 1]} : vector<6x32xf32> to vector<1x32xf32>
    %7 = vector.extract_strided_slice %2 {offsets = [4, 0], sizes = [1, 32], strides = [1, 1]} : vector<6x32xf32> to vector<1x32xf32>
    %8 = vector.extract_strided_slice %2 {offsets = [5, 0], sizes = [1, 32], strides = [1, 1]} : vector<6x32xf32> to vector<1x32xf32>
    %c0_5 = arith.constant 0 : index
    %c0_6 = arith.constant 0 : index
    %9 = vector.load %arg2[%c0_5, %c0_6] : memref<32x96xf32, #tpu.memory_space<vmem>>, vector<32x96xf32>
    %cst = arith.constant dense<0.000000e+00> : vector<16x96xf32>
    %10 = tpu.matmul %0, %9, %cst {dimension_numbers = #tpu.dot_dimension_numbers<[1], [0], [0], [1], [0, 0, 1, 1], [], []>} : vector<16x32xf32>, vector<32x96xf32>, vector<16x96xf32> -> vector<16x96xf32>
    %c0_7 = arith.constant 0 : index
    %c0_8 = arith.constant 0 : index
    %11 = vector.load %arg3[%c0_7, %c0_8] : memref<1x96xf32, #tpu.memory_space<vmem>>, vector<1x96xf32>
    %12 = vector.broadcast %11 : vector<1x96xf32> to vector<16x96xf32>
    %13 = arith.addf %10, %12 : vector<16x96xf32>
    %14 = vector.extract_strided_slice %13 {offsets = [0, 0], sizes = [16, 32], strides = [1, 1]} : vector<16x96xf32> to vector<16x32xf32>
    %15 = vector.shape_cast %14 : vector<16x32xf32> to vector<2x8x32xf32>
    %16 = vector.extract_strided_slice %13 {offsets = [0, 32], sizes = [16, 32], strides = [1, 1]} : vector<16x96xf32> to vector<16x32xf32>
    %17 = vector.shape_cast %16 : vector<16x32xf32> to vector<2x8x32xf32>
    %18 = vector.extract_strided_slice %13 {offsets = [0, 64], sizes = [16, 32], strides = [1, 1]} : vector<16x96xf32> to vector<16x32xf32>
    %19 = vector.shape_cast %18 : vector<16x32xf32> to vector<2x8x32xf32>
    %20 = vector.shape_cast %1 : vector<2x8xf32> to vector<2x1x8xf32>
    %21 = vector.extract_strided_slice %15 {offsets = [0, 0, 0], sizes = [2, 8, 8], strides = [1, 1, 1]} : vector<2x8x32xf32> to vector<2x8x8xf32>
    %22 = vector.extract_strided_slice %17 {offsets = [0, 0, 0], sizes = [2, 8, 8], strides = [1, 1, 1]} : vector<2x8x32xf32> to vector<2x8x8xf32>
    %23 = vector.extract_strided_slice %19 {offsets = [0, 0, 0], sizes = [2, 8, 8], strides = [1, 1, 1]} : vector<2x8x32xf32> to vector<2x8x8xf32>
    "tpu.trace_start"() <{level = 10 : i32, message = "bqd,bkd->bqk"}> : () -> ()
    %cst_9 = arith.constant dense<0.000000e+00> : vector<2x8x8xf32>
    %24 = tpu.matmul %21, %22, %cst_9 {dimension_numbers = #tpu.dot_dimension_numbers<[2], [2], [1], [1], [0, 0, 0, 1, 1, 1], [0], [0]>} : vector<2x8x8xf32>, vector<2x8x8xf32>, vector<2x8x8xf32> -> vector<2x8x8xf32>
    "tpu.trace_stop"() : () -> ()
    %cst_10 = arith.constant 0.353553385 : f32
    %25 = vector.broadcast %cst_10 : f32 to vector<2x8x8xf32>
    %26 = arith.mulf %24, %25 : vector<2x8x8xf32>
    %27 = vector.broadcast %20 : vector<2x1x8xf32> to vector<2x8x8xf32>
    %28 = arith.addf %26, %27 : vector<2x8x8xf32>
    %cst_11 = arith.constant dense<0xFF800000> : vector<2x8xf32>
    %29 = vector.multi_reduction <maximumf>, %28, %cst_11 [2] : vector<2x8x8xf32> to vector<2x8xf32>
    %30 = vector.shape_cast %29 : vector<2x8xf32> to vector<2x8x1xf32>
    %31 = vector.broadcast %30 : vector<2x8x1xf32> to vector<2x8x8xf32>
    %32 = arith.subf %28, %31 : vector<2x8x8xf32>
    %33 = math.exp %32 : vector<2x8x8xf32>
    %cst_12 = arith.constant dense<0.000000e+00> : vector<2x8xf32>
    %34 = vector.multi_reduction <add>, %33, %cst_12 [2] : vector<2x8x8xf32> to vector<2x8xf32>
    %35 = vector.shape_cast %34 : vector<2x8xf32> to vector<2x8x1xf32>
    %36 = tpu.reciprocal %35 {approx = true} : vector<2x8x1xf32> -> vector<2x8x1xf32>
    %37 = vector.broadcast %36 : vector<2x8x1xf32> to vector<2x8x8xf32>
    %38 = arith.mulf %33, %37 : vector<2x8x8xf32>
    "tpu.trace_start"() <{level = 10 : i32, message = "bqk,bkd->bqd"}> : () -> ()
    %cst_13 = arith.constant dense<0.000000e+00> : vector<2x8x8xf32>
    %39 = tpu.matmul %38, %23, %cst_13 {dimension_numbers = #tpu.dot_dimension_numbers<[2], [1], [1], [2], [0, 0, 0, 1, 1, 2], [0], [0]>} : vector<2x8x8xf32>, vector<2x8x8xf32>, vector<2x8x8xf32> -> vector<2x8x8xf32>
    "tpu.trace_stop"() : () -> ()
    %40 = vector.extract_strided_slice %15 {offsets = [0, 0, 8], sizes = [2, 8, 8], strides = [1, 1, 1]} : vector<2x8x32xf32> to vector<2x8x8xf32>
    %41 = vector.extract_strided_slice %17 {offsets = [0, 0, 8], sizes = [2, 8, 8], strides = [1, 1, 1]} : vector<2x8x32xf32> to vector<2x8x8xf32>
    %42 = vector.extract_strided_slice %19 {offsets = [0, 0, 8], sizes = [2, 8, 8], strides = [1, 1, 1]} : vector<2x8x32xf32> to vector<2x8x8xf32>
    "tpu.trace_start"() <{level = 10 : i32, message = "bqd,bkd->bqk"}> : () -> ()
    %cst_14 = arith.constant dense<0.000000e+00> : vector<2x8x8xf32>
    %43 = tpu.matmul %40, %41, %cst_14 {dimension_numbers = #tpu.dot_dimension_numbers<[2], [2], [1], [1], [0, 0, 0, 1, 1, 1], [0], [0]>} : vector<2x8x8xf32>, vector<2x8x8xf32>, vector<2x8x8xf32> -> vector<2x8x8xf32>
    "tpu.trace_stop"() : () -> ()
    %cst_15 = arith.constant 0.353553385 : f32
    %44 = vector.broadcast %cst_15 : f32 to vector<2x8x8xf32>
    %45 = arith.mulf %43, %44 : vector<2x8x8xf32>
    %46 = vector.broadcast %20 : vector<2x1x8xf32> to vector<2x8x8xf32>
    %47 = arith.addf %45, %46 : vector<2x8x8xf32>
    %cst_16 = arith.constant dense<0xFF800000> : vector<2x8xf32>
    %48 = vector.multi_reduction <maximumf>, %47, %cst_16 [2] : vector<2x8x8xf32> to vector<2x8xf32>
    %49 = vector.shape_cast %48 : vector<2x8xf32> to vector<2x8x1xf32>
    %50 = vector.broadcast %49 : vector<2x8x1xf32> to vector<2x8x8xf32>
    %51 = arith.subf %47, %50 : vector<2x8x8xf32>
    %52 = math.exp %51 : vector<2x8x8xf32>
    %cst_17 = arith.constant dense<0.000000e+00> : vector<2x8xf32>
    %53 = vector.multi_reduction <add>, %52, %cst_17 [2] : vector<2x8x8xf32> to vector<2x8xf32>
    %54 = vector.shape_cast %53 : vector<2x8xf32> to vector<2x8x1xf32>
    %55 = tpu.reciprocal %54 {approx = true} : vector<2x8x1xf32> -> vector<2x8x1xf32>
    %56 = vector.broadcast %55 : vector<2x8x1xf32> to vector<2x8x8xf32>
    %57 = arith.mulf %52, %56 : vector<2x8x8xf32>
    "tpu.trace_start"() <{level = 10 : i32, message = "bqk,bkd->bqd"}> : () -> ()
    %cst_18 = arith.constant dense<0.000000e+00> : vector<2x8x8xf32>
    %58 = tpu.matmul %57, %42, %cst_18 {dimension_numbers = #tpu.dot_dimension_numbers<[2], [1], [1], [2], [0, 0, 0, 1, 1, 2], [0], [0]>} : vector<2x8x8xf32>, vector<2x8x8xf32>, vector<2x8x8xf32> -> vector<2x8x8xf32>
    "tpu.trace_stop"() : () -> ()
    %59 = vector.extract_strided_slice %15 {offsets = [0, 0, 16], sizes = [2, 8, 8], strides = [1, 1, 1]} : vector<2x8x32xf32> to vector<2x8x8xf32>
    %60 = vector.extract_strided_slice %17 {offsets = [0, 0, 16], sizes = [2, 8, 8], strides = [1, 1, 1]} : vector<2x8x32xf32> to vector<2x8x8xf32>
    %61 = vector.extract_strided_slice %19 {offsets = [0, 0, 16], sizes = [2, 8, 8], strides = [1, 1, 1]} : vector<2x8x32xf32> to vector<2x8x8xf32>
    "tpu.trace_start"() <{level = 10 : i32, message = "bqd,bkd->bqk"}> : () -> ()
    %cst_19 = arith.constant dense<0.000000e+00> : vector<2x8x8xf32>
    %62 = tpu.matmul %59, %60, %cst_19 {dimension_numbers = #tpu.dot_dimension_numbers<[2], [2], [1], [1], [0, 0, 0, 1, 1, 1], [0], [0]>} : vector<2x8x8xf32>, vector<2x8x8xf32>, vector<2x8x8xf32> -> vector<2x8x8xf32>
    "tpu.trace_stop"() : () -> ()
    %cst_20 = arith.constant 0.353553385 : f32
    %63 = vector.broadcast %cst_20 : f32 to vector<2x8x8xf32>
    %64 = arith.mulf %62, %63 : vector<2x8x8xf32>
    %65 = vector.broadcast %20 : vector<2x1x8xf32> to vector<2x8x8xf32>
    %66 = arith.addf %64, %65 : vector<2x8x8xf32>
    %cst_21 = arith.constant dense<0xFF800000> : vector<2x8xf32>
    %67 = vector.multi_reduction <maximumf>, %66, %cst_21 [2] : vector<2x8x8xf32> to vector<2x8xf32>
    %68 = vector.shape_cast %67 : vector<2x8xf32> to vector<2x8x1xf32>
    %69 = vector.broadcast %68 : vector<2x8x1xf32> to vector<2x8x8xf32>
    %70 = arith.subf %66, %69 : vector<2x8x8xf32>
    %71 = math.exp %70 : vector<2x8x8xf32>
    %cst_22 = arith.constant dense<0.000000e+00> : vector<2x8xf32>
    %72 = vector.multi_reduction <add>, %71, %cst_22 [2] : vector<2x8x8xf32> to vector<2x8xf32>
    %73 = vector.shape_cast %72 : vector<2x8xf32> to vector<2x8x1xf32>
    %74 = tpu.reciprocal %73 {approx = true} : vector<2x8x1xf32> -> vector<2x8x1xf32>
    %75 = vector.broadcast %74 : vector<2x8x1xf32> to vector<2x8x8xf32>
    %76 = arith.mulf %71, %75 : vector<2x8x8xf32>
    "tpu.trace_start"() <{level = 10 : i32, message = "bqk,bkd->bqd"}> : () -> ()
    %cst_23 = arith.constant dense<0.000000e+00> : vector<2x8x8xf32>
    %77 = tpu.matmul %76, %61, %cst_23 {dimension_numbers = #tpu.dot_dimension_numbers<[2], [1], [1], [2], [0, 0, 0, 1, 1, 2], [0], [0]>} : vector<2x8x8xf32>, vector<2x8x8xf32>, vector<2x8x8xf32> -> vector<2x8x8xf32>
    "tpu.trace_stop"() : () -> ()
    %78 = vector.extract_strided_slice %15 {offsets = [0, 0, 24], sizes = [2, 8, 8], strides = [1, 1, 1]} : vector<2x8x32xf32> to vector<2x8x8xf32>
    %79 = vector.extract_strided_slice %17 {offsets = [0, 0, 24], sizes = [2, 8, 8], strides = [1, 1, 1]} : vector<2x8x32xf32> to vector<2x8x8xf32>
    %80 = vector.extract_strided_slice %19 {offsets = [0, 0, 24], sizes = [2, 8, 8], strides = [1, 1, 1]} : vector<2x8x32xf32> to vector<2x8x8xf32>
    "tpu.trace_start"() <{level = 10 : i32, message = "bqd,bkd->bqk"}> : () -> ()
    %cst_24 = arith.constant dense<0.000000e+00> : vector<2x8x8xf32>
    %81 = tpu.matmul %78, %79, %cst_24 {dimension_numbers = #tpu.dot_dimension_numbers<[2], [2], [1], [1], [0, 0, 0, 1, 1, 1], [0], [0]>} : vector<2x8x8xf32>, vector<2x8x8xf32>, vector<2x8x8xf32> -> vector<2x8x8xf32>
    "tpu.trace_stop"() : () -> ()
    %cst_25 = arith.constant 0.353553385 : f32
    %82 = vector.broadcast %cst_25 : f32 to vector<2x8x8xf32>
    %83 = arith.mulf %81, %82 : vector<2x8x8xf32>
    %84 = vector.broadcast %20 : vector<2x1x8xf32> to vector<2x8x8xf32>
    %85 = arith.addf %83, %84 : vector<2x8x8xf32>
    %cst_26 = arith.constant dense<0xFF800000> : vector<2x8xf32>
    %86 = vector.multi_reduction <maximumf>, %85, %cst_26 [2] : vector<2x8x8xf32> to vector<2x8xf32>
    %87 = vector.shape_cast %86 : vector<2x8xf32> to vector<2x8x1xf32>
    %88 = vector.broadcast %87 : vector<2x8x1xf32> to vector<2x8x8xf32>
    %89 = arith.subf %85, %88 : vector<2x8x8xf32>
    %90 = math.exp %89 : vector<2x8x8xf32>
    %cst_27 = arith.constant dense<0.000000e+00> : vector<2x8xf32>
    %91 = vector.multi_reduction <add>, %90, %cst_27 [2] : vector<2x8x8xf32> to vector<2x8xf32>
    %92 = vector.shape_cast %91 : vector<2x8xf32> to vector<2x8x1xf32>
    %93 = tpu.reciprocal %92 {approx = true} : vector<2x8x1xf32> -> vector<2x8x1xf32>
    %94 = vector.broadcast %93 : vector<2x8x1xf32> to vector<2x8x8xf32>
    %95 = arith.mulf %90, %94 : vector<2x8x8xf32>
    "tpu.trace_start"() <{level = 10 : i32, message = "bqk,bkd->bqd"}> : () -> ()
    %cst_28 = arith.constant dense<0.000000e+00> : vector<2x8x8xf32>
    %96 = tpu.matmul %95, %80, %cst_28 {dimension_numbers = #tpu.dot_dimension_numbers<[2], [1], [1], [2], [0, 0, 0, 1, 1, 2], [0], [0]>} : vector<2x8x8xf32>, vector<2x8x8xf32>, vector<2x8x8xf32> -> vector<2x8x8xf32>
    "tpu.trace_stop"() : () -> ()
    %97 = tpu.concatenate %39, %58, %77, %96 in 2 : vector<2x8x8xf32>, vector<2x8x8xf32>, vector<2x8x8xf32>, vector<2x8x8xf32> -> vector<2x8x32xf32>
    %98 = vector.shape_cast %97 : vector<2x8x32xf32> to vector<16x32xf32>
    %c0_29 = arith.constant 0 : index
    %c0_30 = arith.constant 0 : index
    %99 = vector.load %arg4[%c0_29, %c0_30] : memref<32x32xf32, #tpu.memory_space<vmem>>, vector<32x32xf32>
    %cst_31 = arith.constant dense<0.000000e+00> : vector<16x32xf32>
    %100 = tpu.matmul %98, %99, %cst_31 {dimension_numbers = #tpu.dot_dimension_numbers<[1], [0], [0], [1], [0, 0, 1, 1], [], []>} : vector<16x32xf32>, vector<32x32xf32>, vector<16x32xf32> -> vector<16x32xf32>
    %101 = vector.broadcast %3 : vector<1x32xf32> to vector<16x32xf32>
    %102 = arith.addf %100, %101 : vector<16x32xf32>
    %103 = arith.addf %102, %0 : vector<16x32xf32>
    %cst_32 = arith.constant dense<0.000000e+00> : vector<16xf32>
    %104 = vector.multi_reduction <add>, %103, %cst_32 [1] : vector<16x32xf32> to vector<16xf32>
    %105 = vector.shape_cast %104 : vector<16xf32> to vector<16x1xf32>
    %cst_33 = arith.constant 3.200000e+01 : f32
    %106 = vector.broadcast %cst_33 : f32 to vector<16x1xf32>
    %107 = arith.divf %105, %106 : vector<16x1xf32>
    %108 = vector.broadcast %107 : vector<16x1xf32> to vector<16x32xf32>
    %109 = arith.subf %103, %108 : vector<16x32xf32>
    %110 = arith.mulf %109, %109 : vector<16x32xf32>
    %cst_34 = arith.constant dense<0.000000e+00> : vector<16xf32>
    %111 = vector.multi_reduction <add>, %110, %cst_34 [1] : vector<16x32xf32> to vector<16xf32>
    %112 = vector.shape_cast %111 : vector<16xf32> to vector<16x1xf32>
    %cst_35 = arith.constant 3.200000e+01 : f32
    %113 = vector.broadcast %cst_35 : f32 to vector<16x1xf32>
    %114 = arith.divf %112, %113 : vector<16x1xf32>
    %cst_36 = arith.constant 9.99999996E-13 : f32
    %115 = vector.broadcast %cst_36 : f32 to vector<16x1xf32>
    %116 = arith.addf %114, %115 : vector<16x1xf32>
    %117 = math.rsqrt %116 : vector<16x1xf32>
    %118 = vector.broadcast %117 : vector<16x1xf32> to vector<16x32xf32>
    %119 = arith.mulf %109, %118 : vector<16x32xf32>
    %120 = vector.broadcast %4 : vector<1x32xf32> to vector<16x32xf32>
    %121 = arith.mulf %119, %120 : vector<16x32xf32>
    %122 = vector.broadcast %5 : vector<1x32xf32> to vector<16x32xf32>
    %123 = arith.addf %121, %122 : vector<16x32xf32>
    %c0_37 = arith.constant 0 : index
    %c0_38 = arith.constant 0 : index
    %124 = vector.load %arg5[%c0_37, %c0_38] : memref<32x64xf32, #tpu.memory_space<vmem>>, vector<32x64xf32>
    %cst_39 = arith.constant dense<0.000000e+00> : vector<16x64xf32>
    %125 = tpu.matmul %123, %124, %cst_39 {dimension_numbers = #tpu.dot_dimension_numbers<[1], [0], [0], [1], [0, 0, 1, 1], [], []>} : vector<16x32xf32>, vector<32x64xf32>, vector<16x64xf32> -> vector<16x64xf32>
    %c0_40 = arith.constant 0 : index
    %c0_41 = arith.constant 0 : index
    %126 = vector.load %arg6[%c0_40, %c0_41] : memref<1x64xf32, #tpu.memory_space<vmem>>, vector<1x64xf32>
    %127 = vector.broadcast %126 : vector<1x64xf32> to vector<16x64xf32>
    %128 = arith.addf %125, %127 : vector<16x64xf32>
    %cst_42 = arith.constant 5.000000e-01 : f32
    %129 = vector.broadcast %cst_42 : f32 to vector<16x64xf32>
    %130 = arith.mulf %129, %128 : vector<16x64xf32>
    %cst_43 = arith.constant 0.707106769 : f32
    %131 = vector.broadcast %cst_43 : f32 to vector<16x64xf32>
    %132 = arith.mulf %128, %131 : vector<16x64xf32>
    %133 = math.erf %132 : vector<16x64xf32>
    %cst_44 = arith.constant 1.000000e+00 : f32
    %134 = vector.broadcast %cst_44 : f32 to vector<16x64xf32>
    %135 = arith.addf %134, %133 : vector<16x64xf32>
    %136 = arith.mulf %130, %135 : vector<16x64xf32>
    %c0_45 = arith.constant 0 : index
    %c0_46 = arith.constant 0 : index
    %137 = vector.load %arg7[%c0_45, %c0_46] : memref<64x32xf32, #tpu.memory_space<vmem>>, vector<64x32xf32>
    %cst_47 = arith.constant dense<0.000000e+00> : vector<16x32xf32>
    %138 = tpu.matmul %136, %137, %cst_47 {dimension_numbers = #tpu.dot_dimension_numbers<[1], [0], [0], [1], [0, 0, 1, 1], [], []>} : vector<16x64xf32>, vector<64x32xf32>, vector<16x32xf32> -> vector<16x32xf32>
    %139 = vector.broadcast %6 : vector<1x32xf32> to vector<16x32xf32>
    %140 = arith.addf %138, %139 : vector<16x32xf32>
    %141 = arith.addf %140, %123 : vector<16x32xf32>
    %cst_48 = arith.constant dense<0.000000e+00> : vector<16xf32>
    %142 = vector.multi_reduction <add>, %141, %cst_48 [1] : vector<16x32xf32> to vector<16xf32>
    %143 = vector.shape_cast %142 : vector<16xf32> to vector<16x1xf32>
    %cst_49 = arith.constant 3.200000e+01 : f32
    %144 = vector.broadcast %cst_49 : f32 to vector<16x1xf32>
    %145 = arith.divf %143, %144 : vector<16x1xf32>
    %146 = vector.broadcast %145 : vector<16x1xf32> to vector<16x32xf32>
    %147 = arith.subf %141, %146 : vector<16x32xf32>
    %148 = arith.mulf %147, %147 : vector<16x32xf32>
    %cst_50 = arith.constant dense<0.000000e+00> : vector<16xf32>
    %149 = vector.multi_reduction <add>, %148, %cst_50 [1] : vector<16x32xf32> to vector<16xf32>
    %150 = vector.shape_cast %149 : vector<16xf32> to vector<16x1xf32>
    %cst_51 = arith.constant 3.200000e+01 : f32
    %151 = vector.broadcast %cst_51 : f32 to vector<16x1xf32>
    %152 = arith.divf %150, %151 : vector<16x1xf32>
    %cst_52 = arith.constant 9.99999996E-13 : f32
    %153 = vector.broadcast %cst_52 : f32 to vector<16x1xf32>
    %154 = arith.addf %152, %153 : vector<16x1xf32>
    %155 = math.rsqrt %154 : vector<16x1xf32>
    %156 = vector.broadcast %155 : vector<16x1xf32> to vector<16x32xf32>
    %157 = arith.mulf %147, %156 : vector<16x32xf32>
    %158 = vector.broadcast %7 : vector<1x32xf32> to vector<16x32xf32>
    %159 = arith.mulf %157, %158 : vector<16x32xf32>
    %160 = vector.broadcast %8 : vector<1x32xf32> to vector<16x32xf32>
    %161 = arith.addf %159, %160 : vector<16x32xf32>
    %c0_53 = arith.constant 0 : index
    %c0_54 = arith.constant 0 : index
    %162 = vector.load %arg9[%c0_53, %c0_54] : memref<16x32xf32, #tpu.memory_space<vmem>>, vector<16x32xf32>
    tpu.vector_store %arg9[%c0_53, %c0_54], %161 {strides = array<i32>} : memref<16x32xf32, #tpu.memory_space<vmem>>, vector<16x32xf32>,
    return
  }
}

</mosaic_0001>

<bundles_post_ra>
// kernel: tpu_custom_call.1
= control target key start
LH: loop header
LB: loop body
LE: loop exit
PB: predicated region body
PF: predicated region fallthrough
CT: control target
= control target key end

     0   :  { %14 = vsyncpa [#allocation3], 0  ;;  %s2670_s0 = inlined_call_operand.hbm [shape: f32[16,32], index: 0, kind: input, shape index: {}]   ;;  %s2671_s1 = inlined_call_operand.vmem [shape: f32[2,8], index: 1, kind: input, shape index: {}]   ;;  %s2672_s2 = inlined_call_operand.vmem [shape: f32[32,96], index: 2, kind: input, shape index: {}]   ;;  %s2673_s3 = inlined_call_operand.vmem [shape: f32[1,96], index: 3, kind: input, shape index: {}]   ;;  %s2674_s4 = inlined_call_operand.vmem [shape: f32[32,32], index: 4, kind: input, shape index: {}]   ;;  %s2675_s5 = inlined_call_operand.vmem [shape: f32[32,64], index: 5, kind: input, shape index: {}]   ;;  %s2676_s6 = inlined_call_operand.vmem [shape: f32[1,64], index: 6, kind: input, shape index: {}]   ;;  %s2677_s7 = inlined_call_operand.vmem [shape: f32[64,32], index: 7, kind: input, shape index: {}]   ;;  %s2678_s8 = inlined_call_operand.vmem [shape: f32[6,32], index: 8, kind: input, shape index: {}]   ;;  %s2679_s9 = inlined_call_operand.hbm [shape: f32[16,32], index: 9, kind: output, shape index: {}]  }
   0x1   :  { %15 = vsyncpa [#allocation4], 0  ;;  %s2308_s30 = smov [#allocation2]   ;;  %s2260_s13 = scalar_lea.hbm %s2670_s0, 256 }
   0x2   :  { %s21_s10 = sshll.u32 %s2308_s30, 4  ;;  %p2261_p0 = scmp.ne.s32.totalorder %s2670_s0, %s2260_s13  ;;  %s22_s10 = int_to_ptr.vmem [resolvable:$true] %s21_s10 }
   0x3   :  { %p2264_p1 = scmp.lt.u32.totalorder %s2260_s13, %s2670_s0 }
   0x5   :  { %p2266_p2 = pnand %p2264_p1, %p2261_p0 }
   0x7   :  { %2269 = shalt.err (!%p2266_p2)
}
   0x8   :  { %s2270_s18 = scalar_lea.vmem %s22_s10, 256  ;;  %p2275_p4 = scmp.lt.s32.totalorder %s22_s10, %s22_s10 }
   0x9   :  { %p2271_p3 = scmp.ne.s32.totalorder %s22_s10, %s2270_s18  ;;  %p2276_p5 = scmp.lt.s32.totalorder %s2270_s18, %s2270_s18 }
   0xb   :  { %p2277_p6 = por %p2276_p5, %p2275_p4 }
   0xd   :  { %p2278_p7 = pnand %p2277_p6, %p2271_p3 }
   0xf   :  { %2281 = shalt.err (!%p2278_p7)
}
  0x10   :  { %s2309_s19 = smov 128   ;;  %s2310_s20 = smov 8  }
  0x11   :  { %27 = dma.hbm_to_vmem [thread:$0]  %s2670_s0, 256, %s22_s10, [#allocation3], %s2309_s19, %s2309_s19, %s2310_s20  }
  0x12   :  { %2304 = dma.done.wait [#allocation3], 256  }
  0x13   :  { %2305 = vsyncadd [#allocation3], 4294967040  ;;  %vm62_vm0 = vcmask 261120   ;;  %v51_v0 = vld [vmem:[%s2672_s2] sm:$0xff]  ;;  %v52_v1 = vld [vmem:[%s2672_s2 + $0x8] sm:$0xff]  ;;  %v2311_v8 = vmov 0.0   ;;  %v156_v18 = vlaneseq }
  0x14   :  { %v53_v2 = vld [vmem:[%s2672_s2 + $0x10] sm:$0xff]  ;;  %v2156_v3 = vpack.c.bf16 %v52_v1, %v51_v0  ;;  %v54_v4 = vld [vmem:[%s2672_s2 + $0x18] sm:$0xff]  ;;  %v2405_v5 = vld [vmem:[#allocation2] sm:$0xff]  ;;  %2045 = vmatprep.subr.mxu0 %v2311_v8  ;;  %vm2312_vm1 = vmmov 0   ;;  %s2313_s10 = smov 96   ;;  %vm170_vm2 = vcmask 64512  }
  0x15   :  { %v2160_v6 = vpack.c.bf16 %v54_v4, %v53_v2  ;;  %2032 = vmatprep.mubr.msk.f32.mxu1 %vm62_vm0, %v2405_v5  ;;  %v2409_v7 = vld [vmem:[#allocation2 + $0x8] sm:$0xff]  ;;  %2047 = vmatprep.mubr.msk.f32.mxu0 %vm2312_vm1, %v2311_v8  ;;  %v1929_v9 = vld [vmem:[%s2673_s3] ss:$0 sm:$0xff]  ;;  %v2314_v16 = vmov 1966171168   ;;  %v2440_v20 = vshrl.u32 %v156_v18, 7 }
  0x16   :  { %2157 = vmatprep.subr.bf16.mxu1 %v2156_v3  ;;  %v154_v17 = vunpack.c.l.s4 %v2314_v16  ;;  %v1932_v22 = vld.sshfl [vmem:[%s2671_s1] sm:$0x11 pattern:$0x75316420]  ;;  %s2315_s1 = smov 64   ;;  %s2316_s12 = smov 88  }
  0x17   :  { %2159 = vmatpush3.bf16.msra.mxu1 %v2156_v3  ;;  %v152_v23 = vcombine.high %v1932_v22, %v1932_v22  ;;  %v2447_v25 = vsub.s32 0, %v2440_v20  ;;  %s2317_s13 = smov 120   ;;  %s2318_s14 = smov 56   ;;  %vm1541_vm3 = vcmask 195584   ;;  %vm1538_vm4 = vcmask 130048  }
  0x18   :  { %2161 = vmatprep.subr.bf16.mxu1 %v2160_v6  ;;  %v155_v19 = vunpack.c.0.s8 %v154_v17  ;;  %s2319_s15 = smov 80   ;;  %s2320_s16 = smov 112   ;;  %vm1788_vm5 = vcmask 523264  }
  0x19   :  { %s2321_s17 = smov 48   ;;  %s2322_s18 = smov 72  }
  0x1a   :  { %v158_v21 = vsub.s32 %v155_v19, %v2440_v20  ;;  %s2323_s21 = smov 104   ;;  %s2324_s22 = smov 40  }
  0x1b   :  { %2163 = vmatpush3.bf16.msra.mxu1 %v2160_v6  ;;  %s2325_s23 = smov 16   ;;  %s2326_s2 = smov 24  }
  0x1c   :  { %2035 = vmatprep.subr.mxu1 %v2311_v8  ;;  %v159_v24 = vrot.slane %v1932_v22, %v158_v21  ;;  %v166_v27 = vrot.slane %v152_v23, %v158_v21 }
  0x1e   :  { %2033 = vmatmul.mubr.msk.f32.vlgmr.msra.gmra.mrb[0].mxu1 %vm62_vm0, %v2409_v7  ;;  %v2450_v26 = vrot.slane %v159_v24, %v2447_v25  ;;  %v2454_v32 = vrot.slane %v166_v27, %v2447_v25 }
  0x1f   :  { %2037 = vmatprep.mubr.msk.f32.mxu1 %vm2312_vm1, %v2311_v8 }
  0xf1   :  { %v2034_v10 = vpop.f32.mrb[0].mxu1 }
  0xf2   :  { %v135_v11 = vpop.f32.mrb[1].mxu1  ;;  %v2425_v13 = vadd.f32 %v2034_v10, %v1929_v9 }
  0xf3   :  { %v2422_v12 = vadd.f32 %v1929_v9, %v135_v11 }
  0xf5   :  { %168 = vrot.lane.b32.xlu0 %v2422_v12, %s2313_s10 }
  0xf9   :  { %246 = vrot.lane.b32.xlu0 %v2425_v13, %s2313_s10 }
 0x167   :  { %v169_v14 = vpop.permute.xlu0 %168 }
 0x168   :  { %2036 = vmatpush3.xpose.msk.msra.mxu1 %vm170_vm2, %v169_v14 }
 0x169   :  { %2040 = vmatprep.subr.mxu1 %v2311_v8 }
 0x16b   :  { %2038 = vmatmul.mubr.msk.f32.vlgmr.msra.gmra.mrb[2].mxu1 %vm170_vm2, %v2422_v12  ;;  %v247_v15 = vpop.permute.xlu0 %246 }
 0x16c   :  { %2041 = vmatpush3.xpose.msk.msra.mxu1 %vm170_vm2, %v247_v15  ;;  %2042 = vmatprep.mubr.msk.f32.mxu1 %vm2312_vm1, %v2311_v8 }
 0x16d   :  { %2050 = vmatprep.subr.mxu1 %v2311_v8 }
 0x16f   :  { %2043 = vmatmul.mubr.msk.f32.vlgmr.msra.gmra.mrb[4].mxu1 %vm170_vm2, %v2425_v13 }
 0x170   :  { %2052 = vmatprep.mubr.msk.f32.mxu1 %vm2312_vm1, %v2311_v8 }
 0x23e   :  { %v241_v28 = vpop.f32.mrb[2].mxu1 }
 0x23f   :  { %v322_v29 = vmul.f32 0.35355338, %v241_v28  ;;  %v2039_v30 = vpop.f32.mrb[3].mxu1 }
 0x241   :  { %v334_v31 = vadd.f32 %v2450_v26, %v322_v29 }
 0x242   :  { %v318_v33 = vpop.f32.mrb[4].mxu1 }
 0x243   :  { %v323_v34 = vmul.f32 0.35355338, %v318_v33  ;;  %v2044_v35 = vpop.f32.mrb[5].mxu1  ;;  %v336_v36 = vsel %vm170_vm2, %v334_v31, -inf }
 0x244   :  { %337 = vmax.xlane.f32.xlu1 %v336_v36 }
 0x245   :  { %v335_v37 = vadd.f32 %v2454_v32, %v323_v34 }
 0x247   :  { %v339_v38 = vsel %vm170_vm2, %v335_v37, -inf }
 0x248   :  { %340 = vmax.xlane.f32.xlu1 %v339_v38 }
 0x259   :  { %358 = vrot.lane.b32.xlu1 %v2422_v12, %s2315_s1 }
 0x25d   :  { %434 = vrot.lane.b32.xlu1 %v2425_v13, %s2315_s1 }
 0x261   :  { %512 = vrot.lane.b32.xlu1 %v2422_v12, %s2316_s12 }
 0x265   :  { %590 = vrot.lane.b32.xlu1 %v2425_v13, %s2316_s12 }
 0x2d1   :  { %v338_v39 = vpop.xlane.xlu1 %337 }
 0x2d2   :  { %v342_v40 = vsub.f32 %v334_v31, %v338_v39 }
 0x2d4   :  { %v344_v41 = vmul.f32 1.442695, %v342_v40 }
 0x2d5   :  { %v341_v42 = vpop.xlane.xlu1 %340 }
 0x2d6   :  { %2216 = vpow2.f32 %v344_v41  ;;  %v343_v43 = vsub.f32 %v335_v37, %v341_v42 }
 0x2d8   :  { %v346_v44 = vmul.f32 1.442695, %v343_v43 }
 0x2d9   :  { %v359_v45 = vpop.permute.xlu1 %358 }
 0x2da   :  { %2218 = vpow2.f32 %v346_v44  ;;  %2046 = vmatpush3.msra.mxu0 %v359_v45 }
 0x2db   :  { %2055 = vmatprep.subr.mxu0 %v2311_v8 }
 0x2dd   :  { %v435_v46 = vpop.permute.xlu1 %434 }
 0x2de   :  { %2051 = vmatpush3.msra.mxu1 %v435_v46 }
 0x2df   :  { %2060 = vmatprep.subr.mxu1 %v2311_v8 }
 0x2e0   :  { %v2217_v47 = vpop.eup %2216 }
 0x2e1   :  { %v348_v48 = vsel %vm170_vm2, %v2217_v47, 0.0  ;;  %v513_v51 = vpop.permute.xlu1 %512 }
 0x2e2   :  { %349 = vadd.xlane.f32.xlu0 %v348_v48 }
 0x2e4   :  { %v2219_v49 = vpop.eup %2218 }
 0x2e5   :  { %v351_v50 = vsel %vm170_vm2, %v2219_v49, 0.0  ;;  %v591_v52 = vpop.permute.xlu1 %590 }
 0x2e6   :  { %352 = vadd.xlane.f32.xlu1 %v351_v50 }
 0x2f7   :  { %588 = vrot.lane.b32.xlu1 %v2425_v13, %s2317_s13 }
 0x2f8   :  { %510 = vrot.lane.b32.xlu0 %v2422_v12, %s2317_s13 }
 0x36f   :  { %v350_v53 = vpop.xlane.xlu0 %349 }
 0x370   :  { %2220 = vrcp.f32 %v350_v53 }
 0x373   :  { %v353_v54 = vpop.xlane.xlu1 %352  ;;  %v511_v59 = vpop.permute.xlu0 %510 }
 0x374   :  { %2222 = vrcp.f32 %v353_v54 }
 0x377   :  { %v589_v60 = vpop.permute.xlu1 %588 }
 0x37a   :  { %v2221_v55 = vpop.eup %2220 }
 0x37b   :  { %v356_v56 = vmul.f32 %v2221_v55, %v2217_v47 }
 0x37d   :  { %2048 = vmatmul.mubr.msk.f32.vlgmr.msra.gmra.mrb[0].mxu0 %vm170_vm2, %v356_v56 }
 0x37e   :  { %v2223_v57 = vpop.eup %2222  ;;  %2056 = vmatpush3.xpose.msk.msra.mxu0 %vm170_vm2, %v513_v51  ;;  %2057 = vmatprep.mubr.msk.f32.mxu0 %vm2312_vm1, %v2311_v8 }
 0x37f   :  { %v357_v58 = vmul.f32 %v2223_v57, %v2219_v49  ;;  %2065 = vmatprep.subr.mxu0 %v2311_v8 }
 0x381   :  { %2053 = vmatmul.mubr.msk.f32.vlgmr.msra.gmra.mrb[6].mxu1 %vm170_vm2, %v357_v58  ;;  %2058 = vmatmul.mubr.msk.f32.vlgmr.msra.gmra.mrb[2].mxu0 %vm170_vm2, %v511_v59 }
 0x382   :  { %2061 = vmatpush3.xpose.msk.msra.mxu1 %vm170_vm2, %v591_v52  ;;  %2062 = vmatprep.mubr.msk.f32.mxu1 %vm2312_vm1, %v2311_v8 }
 0x383   :  { %2070 = vmatprep.subr.mxu1 %v2311_v8  ;;  %2067 = vmatprep.mubr.msk.f32.mxu0 %vm2312_vm1, %v2311_v8 }
 0x385   :  { %2063 = vmatmul.mubr.msk.f32.vlgmr.msra.gmra.mrb[8].mxu1 %vm170_vm2, %v589_v60 }
 0x386   :  { %2072 = vmatprep.mubr.msk.f32.mxu1 %vm2312_vm1, %v2311_v8 }
 0x450   :  { %v2485_v61 = vpop.f32.mrb[0].mxu0 }
 0x451   :  { %v2049_v62 = vpop.f32.mrb[1].mxu0 }
 0x454   :  { %v2487_v63 = vpop.f32.mrb[6].mxu1  ;;  %v584_v0 = vpop.f32.mrb[2].mxu0 }
 0x455   :  { %v666_v1 = vmul.f32 0.35355338, %v584_v0  ;;  %v2054_v2 = vpop.f32.mrb[7].mxu1  ;;  %v2059_v3 = vpop.f32.mrb[3].mxu0 }
 0x457   :  { %v668_v4 = vadd.f32 %v666_v1, %v2450_v26 }
 0x458   :  { %v662_v6 = vpop.f32.mrb[8].mxu1 }
 0x459   :  { %v667_v9 = vmul.f32 0.35355338, %v662_v6  ;;  %v2064_v10 = vpop.f32.mrb[9].mxu1  ;;  %v670_v11 = vsel %vm170_vm2, %v668_v4, -inf }
 0x45a   :  { %671 = vmax.xlane.f32.xlu1 %v670_v11 }
 0x45b   :  { %v669_v14 = vadd.f32 %v667_v9, %v2454_v32 }
 0x45d   :  { %v673_v15 = vsel %vm170_vm2, %v669_v14, -inf }
 0x45e   :  { %674 = vmax.xlane.f32.xlu0 %v673_v15 }
 0x46b   :  { %692 = vrot.lane.b32.xlu1 %v2422_v12, %s2318_s14 }
 0x46f   :  { %846 = vrot.lane.b32.xlu1 %v2422_v12, %s2319_s15 }
 0x473   :  { %924 = vrot.lane.b32.xlu1 %v2425_v13, %s2319_s15 }
 0x474   :  { %768 = vrot.lane.b32.xlu0 %v2425_v13, %s2318_s14 }
 0x478   :  { %844 = vrot.lane.b32.xlu0 %v2422_v12, %s2320_s16 }
 0x4e7   :  { %v672_v16 = vpop.xlane.xlu1 %671 }
 0x4e8   :  { %v676_v17 = vsub.f32 %v668_v4, %v672_v16 }
 0x4ea   :  { %v678_v18 = vmul.f32 1.442695, %v676_v17 }
 0x4eb   :  { %v693_v19 = vpop.permute.xlu1 %692  ;;  %v675_v21 = vpop.xlane.xlu0 %674 }
 0x4ec   :  { %2224 = vpow2.f32 %v678_v18  ;;  %v677_v22 = vsub.f32 %v669_v14, %v675_v21  ;;  %2066 = vmatpush3.msra.mxu0 %v693_v19 }
 0x4ed   :  { %2075 = vmatprep.subr.mxu0 %v2311_v8 }
 0x4ee   :  { %v680_v23 = vmul.f32 1.442695, %v677_v22 }
 0x4ef   :  { %v769_v24 = vpop.permute.xlu0 %768  ;;  %v847_v31 = vpop.permute.xlu1 %846 }
 0x4f0   :  { %2226 = vpow2.f32 %v680_v23  ;;  %2071 = vmatpush3.msra.mxu1 %v769_v24 }
 0x4f1   :  { %2080 = vmatprep.subr.mxu1 %v2311_v8 }
 0x4f3   :  { %v925_v33 = vpop.permute.xlu1 %924  ;;  %v845_v40 = vpop.permute.xlu0 %844 }
 0x4f6   :  { %v2225_v27 = vpop.eup %2224 }
 0x4f7   :  { %v682_v28 = vsel %vm170_vm2, %v2225_v27, 0.0 }
 0x4f8   :  { %683 = vadd.xlane.f32.xlu1 %v682_v28 }
 0x4fa   :  { %v2227_v29 = vpop.eup %2226 }
 0x4fb   :  { %v685_v30 = vsel %vm170_vm2, %v2227_v29, 0.0 }
 0x4fc   :  { %686 = vadd.xlane.f32.xlu1 %v685_v30 }
 0x50d   :  { %922 = vrot.lane.b32.xlu1 %v2425_v13, %s2320_s16 }
 0x585   :  { %v684_v34 = vpop.xlane.xlu1 %683 }
 0x586   :  { %2228 = vrcp.f32 %v684_v34 }
 0x589   :  { %v687_v35 = vpop.xlane.xlu1 %686 }
 0x58a   :  { %2230 = vrcp.f32 %v687_v35 }
 0x58d   :  { %v923_v41 = vpop.permute.xlu1 %922 }
 0x590   :  { %v2229_v36 = vpop.eup %2228 }
 0x591   :  { %v690_v37 = vmul.f32 %v2229_v36, %v2225_v27 }
 0x593   :  { %2068 = vmatmul.mubr.msk.f32.vlgmr.msra.gmra.mrb[4].mxu0 %vm170_vm2, %v690_v37 }
 0x594   :  { %v2231_v38 = vpop.eup %2230  ;;  %2076 = vmatpush3.xpose.msk.msra.mxu0 %vm170_vm2, %v847_v31  ;;  %2077 = vmatprep.mubr.msk.f32.mxu0 %vm2312_vm1, %v2311_v8 }
 0x595   :  { %v691_v39 = vmul.f32 %v2231_v38, %v2227_v29  ;;  %2085 = vmatprep.subr.mxu0 %v2311_v8 }
 0x597   :  { %2073 = vmatmul.mubr.msk.f32.vlgmr.msra.gmra.mrb[10].mxu1 %vm170_vm2, %v691_v39  ;;  %2078 = vmatmul.mubr.msk.f32.vlgmr.msra.gmra.mrb[6].mxu0 %vm170_vm2, %v845_v40 }
 0x598   :  { %2081 = vmatpush3.xpose.msk.msra.mxu1 %vm170_vm2, %v925_v33  ;;  %2082 = vmatprep.mubr.msk.f32.mxu1 %vm2312_vm1, %v2311_v8 }
 0x599   :  { %2090 = vmatprep.subr.mxu1 %v2311_v8  ;;  %2087 = vmatprep.mubr.msk.f32.mxu0 %vm2312_vm1, %v2311_v8 }
 0x59b   :  { %2083 = vmatmul.mubr.msk.f32.vlgmr.msra.gmra.mrb[12].mxu1 %vm170_vm2, %v923_v41 }
 0x59c   :  { %2092 = vmatprep.mubr.msk.f32.mxu1 %vm2312_vm1, %v2311_v8 }
 0x666   :  { %v2519_v42 = vpop.f32.mrb[4].mxu0 }
 0x667   :  { %v2069_v43 = vpop.f32.mrb[5].mxu0 }
 0x66a   :  { %v2521_v44 = vpop.f32.mrb[10].mxu1  ;;  %v918_v45 = vpop.f32.mrb[6].mxu0 }
 0x66b   :  { %v1000_v46 = vmul.f32 0.35355338, %v918_v45  ;;  %v2074_v47 = vpop.f32.mrb[11].mxu1  ;;  %v2079_v48 = vpop.f32.mrb[7].mxu0 }
 0x66d   :  { %v1002_v49 = vadd.f32 %v1000_v46, %v2450_v26 }
 0x66e   :  { %v996_v50 = vpop.f32.mrb[12].mxu1 }
 0x66f   :  { %v1001_v51 = vmul.f32 0.35355338, %v996_v50  ;;  %v2084_v52 = vpop.f32.mrb[13].mxu1  ;;  %v1004_v53 = vsel %vm170_vm2, %v1002_v49, -inf }
 0x670   :  { %1005 = vmax.xlane.f32.xlu0 %v1004_v53  ;;  %v1544_v53 = vld [vmem:[%s2674_s4] sm:$0xff] }
 0x671   :  { %v1003_v54 = vadd.f32 %v1001_v51, %v2454_v32 }
 0x673   :  { %v1007_v55 = vsel %vm170_vm2, %v1003_v54, -inf }
 0x674   :  { %1008 = vmax.xlane.f32.xlu1 %v1007_v55  ;;  %v1546_v55 = vld [vmem:[%s2674_s4 + $0x10] sm:$0xff] }
 0x685   :  { %1026 = vrot.lane.b32.xlu1 %v2422_v12, %s2321_s17 }
 0x686   :  { %1102 = vrot.lane.b32.xlu0 %v2425_v13, %s2321_s17 }
 0x689   :  { %1180 = vrot.lane.b32.xlu1 %v2422_v12, %s2322_s18 }
 0x68d   :  { %1258 = vrot.lane.b32.xlu1 %v2425_v13, %s2322_s18 }
 0x691   :  { %1256 = vrot.lane.b32.xlu1 %v2425_v13, %s2323_s21 }
 0x6fd   :  { %v1006_v56 = vpop.xlane.xlu0 %1005 }
 0x6fe   :  { %v1010_v57 = vsub.f32 %v1002_v49, %v1006_v56  ;;  %v1547_v56 = vld [vmem:[%s2674_s4 + $0x18] sm:$0xff] }
 0x700   :  { %v1012_v58 = vmul.f32 1.442695, %v1010_v57  ;;  %v2168_v57 = vpack.c.bf16 %v1547_v56, %v1546_v55  ;;  %v1776_v55 = vld [vmem:[%s2677_s7] sm:$0xff]  ;;  %v1777_v56 = vld [vmem:[%s2677_s7 + $0x8] sm:$0xff] }
 0x701   :  { %v1009_v59 = vpop.xlane.xlu1 %1008  ;;  %v1103_v60 = vpop.permute.xlu0 %1102 }
 0x702   :  { %2232 = vpow2.f32 %v1012_v58  ;;  %v1011_v62 = vsub.f32 %v1003_v54, %v1009_v59  ;;  %2091 = vmatpush3.msra.mxu1 %v1103_v60 }
 0x703   :  { %2100 = vmatprep.subr.mxu1 %v2311_v8 }
 0x704   :  { %v1014_v0 = vmul.f32 1.442695, %v1011_v62 }
 0x705   :  { %v1027_v1 = vpop.permute.xlu1 %1026 }
 0x706   :  { %2234 = vpow2.f32 %v1014_v0  ;;  %2086 = vmatpush3.msra.mxu0 %v1027_v1 }
 0x707   :  { %2095 = vmatprep.subr.mxu0 %v2311_v8 }
 0x709   :  { %v1181_v11 = vpop.permute.xlu1 %1180 }
 0x70c   :  { %v2233_v2 = vpop.eup %2232 }
 0x70d   :  { %v1016_v3 = vsel %vm170_vm2, %v2233_v2, 0.0  ;;  %v1259_v17 = vpop.permute.xlu1 %1258 }
 0x70e   :  { %1017 = vadd.xlane.f32.xlu0 %v1016_v3 }
 0x710   :  { %v2235_v4 = vpop.eup %2234 }
 0x711   :  { %v1019_v6 = vsel %vm170_vm2, %v2235_v4, 0.0  ;;  %v1257_v21 = vpop.permute.xlu1 %1256 }
 0x712   :  { %1020 = vadd.xlane.f32.xlu0 %v1019_v6 }
 0x728   :  { %1178 = vrot.lane.b32.xlu0 %v2422_v12, %s2323_s21 }
 0x79b   :  { %v1018_v9 = vpop.xlane.xlu0 %1017 }
 0x79c   :  { %2236 = vrcp.f32 %v1018_v9 }
 0x79f   :  { %v1021_v10 = vpop.xlane.xlu0 %1020 }
 0x7a0   :  { %2238 = vrcp.f32 %v1021_v10 }
 0x7a3   :  { %v1179_v19 = vpop.permute.xlu0 %1178 }
 0x7a6   :  { %v2237_v14 = vpop.eup %2236 }
 0x7a7   :  { %v1024_v15 = vmul.f32 %v2237_v14, %v2233_v2 }
 0x7a9   :  { %2088 = vmatmul.mubr.msk.f32.vlgmr.msra.gmra.mrb[8].mxu0 %vm170_vm2, %v1024_v15 }
 0x7aa   :  { %v2239_v16 = vpop.eup %2238  ;;  %2096 = vmatpush3.xpose.msk.msra.mxu0 %vm170_vm2, %v1181_v11  ;;  %2097 = vmatprep.mubr.msk.f32.mxu0 %vm2312_vm1, %v2311_v8 }
 0x7ab   :  { %v1025_v18 = vmul.f32 %v2239_v16, %v2235_v4  ;;  %2105 = vmatprep.subr.mxu0 %v2311_v8 }
 0x7ad   :  { %2093 = vmatmul.mubr.msk.f32.vlgmr.msra.gmra.mrb[14].mxu1 %vm170_vm2, %v1025_v18  ;;  %2098 = vmatmul.mubr.msk.f32.vlgmr.msra.gmra.mrb[10].mxu0 %vm170_vm2, %v1179_v19 }
 0x7ae   :  { %2101 = vmatpush3.xpose.msk.msra.mxu1 %vm170_vm2, %v1259_v17  ;;  %2102 = vmatprep.mubr.msk.f32.mxu1 %vm2312_vm1, %v2311_v8  ;;  %v2588_v17 = vld [vmem:[%s2678_s8] sm:$0x3f] }
 0x7af   :  { %2110 = vmatprep.subr.mxu1 %v2311_v8  ;;  %2107 = vmatprep.mubr.msk.f32.mxu0 %vm2312_vm1, %v2311_v8 }
 0x7b1   :  { %2103 = vmatmul.mubr.msk.f32.vlgmr.msra.gmra.mrb[16].mxu1 %vm170_vm2, %v1257_v21 }
 0x7b2   :  { %2112 = vmatprep.mubr.msk.f32.mxu1 %vm2312_vm1, %v2311_v8 }
 0x87c   :  { %v1098_v22 = vpop.f32.mrb[8].mxu0 }
 0x87d   :  { %v2089_v23 = vpop.f32.mrb[9].mxu0 }
 0x880   :  { %v1174_v24 = vpop.f32.mrb[14].mxu1  ;;  %v1252_v27 = vpop.f32.mrb[10].mxu0 }
 0x881   :  { %v1334_v28 = vmul.f32 0.35355338, %v1252_v27  ;;  %v2094_v29 = vpop.f32.mrb[15].mxu1  ;;  %v2099_v30 = vpop.f32.mrb[11].mxu0 }
 0x883   :  { %v1336_v31 = vadd.f32 %v1334_v28, %v2450_v26 }
 0x884   :  { %v1330_v33 = vpop.f32.mrb[16].mxu1 }
 0x885   :  { %v1335_v34 = vmul.f32 0.35355338, %v1330_v33  ;;  %v2104_v35 = vpop.f32.mrb[17].mxu1  ;;  %v1338_v36 = vsel %vm170_vm2, %v1336_v31, -inf }
 0x886   :  { %1339 = vmax.xlane.f32.xlu0 %v1338_v36 }
 0x887   :  { %v1337_v37 = vadd.f32 %v1335_v34, %v2454_v32 }
 0x889   :  { %v1341_v38 = vsel %vm170_vm2, %v1337_v37, -inf }
 0x88a   :  { %1342 = vmax.xlane.f32.xlu1 %v1341_v38 }
 0x89b   :  { %1360 = vrot.lane.b32.xlu1 %v2422_v12, %s2324_s22 }
 0x89f   :  { %1514 = vrot.lane.b32.xlu1 %v2519_v42, %s2310_s20 }
 0x8a3   :  { %1516 = vrot.lane.b32.xlu1 %v2521_v44, %s2310_s20 }
 0x8a7   :  { %1524 = vrot.lane.b32.xlu1 %v1174_v24, %s2325_s23 }
 0x913   :  { %v1340_v8 = vpop.xlane.xlu0 %1339 }
 0x914   :  { %v1344_v26 = vsub.f32 %v1336_v31, %v1340_v8  ;;  %v1676_v8 = vld [vmem:[%s2675_s5 + $0x10] sm:$0xff] }
 0x916   :  { %v1346_v39 = vmul.f32 1.442695, %v1344_v26  ;;  %v1677_v26 = vld [vmem:[%s2675_s5 + $0x18] sm:$0xff] }
 0x917   :  { %v1343_v40 = vpop.xlane.xlu1 %1342 }
 0x918   :  { %2240 = vpow2.f32 %v1346_v39  ;;  %v1345_v32 = vsub.f32 %v1337_v37, %v1343_v40  ;;  %v1675_v37 = vld [vmem:[%s2675_s5 + $0x8] sm:$0xff]  ;;  %v2176_v39 = vpack.c.bf16 %v1677_v26, %v1676_v8 }
 0x91a   :  { %v1348_v41 = vmul.f32 1.442695, %v1345_v32 }
 0x91b   :  { %v1361_v43 = vpop.permute.xlu1 %1360 }
 0x91c   :  { %2242 = vpow2.f32 %v1348_v41  ;;  %2106 = vmatpush3.msra.mxu0 %v1361_v43 }
 0x91f   :  { %v1515_v0 = vpop.permute.xlu1 %1514 }
 0x920   :  { %v1536_v3 = vsel %vm170_vm2, %v2485_v61, %v1515_v0  ;;  %v1551_v61 = vrot.slane %v2588_v17, %v2447_v25  ;;  %v1781_v0 = vld [vmem:[%s2677_s7 + $0x28] sm:$0xff] }
 0x922   :  { %v2241_v45 = vpop.eup %2240 }
 0x923   :  { %v1350_v12 = vsel %vm170_vm2, %v2241_v45, 0.0  ;;  %v1517_v1 = vpop.permute.xlu1 %1516 }
 0x924   :  { %1351 = vadd.xlane.f32.xlu0 %v1350_v12  ;;  %v1537_v11 = vsel %vm170_vm2, %v2487_v63, %v1517_v1 }
 0x926   :  { %v2243_v42 = vpop.eup %2242 }
 0x927   :  { %v1353_v46 = vsel %vm170_vm2, %v2243_v42, 0.0  ;;  %v1525_v4 = vpop.permute.xlu1 %1524 }
 0x928   :  { %1354 = vadd.xlane.f32.xlu0 %v1353_v46  ;;  %v1540_v14 = vsel %vm1538_vm4, %v1537_v11, %v1525_v4  ;;  %v1670_v46 = vsub.s32 2, %v2440_v20 }
 0x93e   :  { %1436 = vrot.lane.b32.xlu0 %v2425_v13, %s2324_s22  ;;  %v1545_v13 = vld [vmem:[%s2674_s4 + $0x8] sm:$0xff] }
 0x93f   :  { %v2164_v54 = vpack.c.bf16 %v1545_v13, %v1544_v53 }
 0x941   :  { %2165 = vmatprep.subr.bf16.mxu0 %v2164_v54 }
 0x942   :  { %1522 = vrot.lane.b32.xlu0 %v1098_v22, %s2325_s23 }
 0x9b1   :  { %v1352_v44 = vpop.xlane.xlu0 %1351 }
 0x9b2   :  { %2244 = vrcp.f32 %v1352_v44 }
 0x9b5   :  { %v1355_v47 = vpop.xlane.xlu0 %1354 }
 0x9b6   :  { %2246 = vrcp.f32 %v1355_v47 }
 0x9b9   :  { %v1437_v48 = vpop.permute.xlu0 %1436 }
 0x9ba   :  { %2111 = vmatpush3.msra.mxu1 %v1437_v48 }
 0x9bc   :  { %v2245_v49 = vpop.eup %2244 }
 0x9bd   :  { %v1358_v50 = vmul.f32 %v2245_v49, %v2241_v45  ;;  %v1523_v2 = vpop.permute.xlu0 %1522  ;;  %v1671_v49 = vrot.slane %v2588_v17, %v1670_v46 }
 0x9be   :  { %v1539_v6 = vsel %vm1538_vm4, %v1536_v3, %v1523_v2  ;;  %v1782_v2 = vld [vmem:[%s2677_s7 + $0x30] sm:$0xff]  ;;  %v1783_v3 = vld [vmem:[%s2677_s7 + $0x38] sm:$0xff] }
 0x9bf   :  { %2108 = vmatmul.mubr.msk.f32.vlgmr.msra.gmra.mrb[12].mxu0 %vm170_vm2, %v1358_v50  ;;  %v2192_v4 = vpack.c.bf16 %v1783_v3, %v1782_v2 }
 0x9c0   :  { %v2247_v51 = vpop.eup %2246  ;;  %2167 = vmatpush3.bf16.msra.mxu0 %v2164_v54 }
 0x9c1   :  { %v1359_v52 = vmul.f32 %v2247_v51, %v2243_v42  ;;  %2169 = vmatprep.subr.bf16.mxu0 %v2168_v57  ;;  %v1664_v42 = vsub.s32 1, %v2440_v20 }
 0x9c3   :  { %2113 = vmatmul.mubr.msk.f32.vlgmr.msra.gmra.mrb[18].mxu1 %vm170_vm2, %v1359_v52  ;;  %v1665_v44 = vrot.slane %v2588_v17, %v1664_v42 }
 0x9c4   :  { %2171 = vmatpush3.bf16.msra.mxu0 %v2168_v57  ;;  %v2180_v57 = vpack.c.bf16 %v1777_v56, %v1776_v55 }
 0x9c6   :  { %2181 = vmatprep.subr.bf16.mxu0 %v2180_v57 }
 0xa92   :  { %v1432_v58 = vpop.f32.mrb[12].mxu0 }
 0xa93   :  { %1530 = vrot.lane.b32.xlu0 %v1432_v58, %s2326_s2  ;;  %v2109_v59 = vpop.f32.mrb[13].mxu0  ;;  %v1778_v58 = vld [vmem:[%s2677_s7 + $0x10] sm:$0xff] }
 0xa94   :  { %v1779_v59 = vld [vmem:[%s2677_s7 + $0x18] sm:$0xff] }
 0xa96   :  { %v1508_v60 = vpop.f32.mrb[18].mxu1 }
 0xa97   :  { %1532 = vrot.lane.b32.xlu1 %v1508_v60, %s2326_s2  ;;  %v2114_v62 = vpop.f32.mrb[19].mxu1  ;;  %v2184_v60 = vpack.c.bf16 %v1779_v59, %v1778_v58 }
 0xa98   :  { %v1780_v62 = vld [vmem:[%s2677_s7 + $0x20] sm:$0xff] }
 0xa99   :  { %v2188_v1 = vpack.c.bf16 %v1781_v0, %v1780_v62 }
 0xb05   :  { %v1531_v9 = vpop.permute.xlu0 %1530 }
 0xb06   :  { %v1542_v10 = vsel %vm1541_vm3, %v1539_v6, %v1531_v9  ;;  %v1959_v6 = vld [vmem:[%s2676_s6] ss:$0 sm:$0xff]  ;;  %s2327_s6 = smov [#allocation5]  }
 0xb07   :  { %2123 = vmatprep.mubr.msk.f32.mxu0 %vm62_vm0, %v1542_v10  ;;  %s1917_s7 = sshll.u32 %s2327_s6, 4  ;;  %s1918_s7 = int_to_ptr.vmem [resolvable:$true] %s1917_s7 }
 0xb08   :  { %s2282_s8 = scalar_lea.vmem %s1918_s7, 256  ;;  %p2287_p9 = scmp.lt.s32.totalorder %s1918_s7, %s1918_s7 }
 0xb09   :  { %v1533_v15 = vpop.permute.xlu1 %1532  ;;  %p2283_p8 = scmp.ne.s32.totalorder %s1918_s7, %s2282_s8  ;;  %p2288_p10 = scmp.lt.s32.totalorder %s2282_s8, %s2282_s8 }
 0xb0a   :  { %v1543_v16 = vsel %vm1541_vm3, %v1540_v14, %v1533_v15 }
 0xb0b   :  { %2124 = vmatmul.mubr.msk.f32.vlgmr.msra.gmra.mrb[14].mxu0 %vm62_vm0, %v1543_v16  ;;  %p2289_p11 = por %p2288_p10, %p2287_p9 }
 0xb0c   :  { %2183 = vmatpush3.bf16.msra.mxu0 %v2180_v57 }
 0xb0d   :  { %2185 = vmatprep.subr.bf16.mxu0 %v2184_v60  ;;  %p2290_p12 = pnand %p2289_p11, %p2283_p8 }
 0xb10   :  { %2187 = vmatpush3.bf16.msra.mxu0 %v2184_v60 }
 0xb11   :  { %2189 = vmatprep.subr.bf16.mxu0 %v2188_v1 }
 0xb14   :  { %2191 = vmatpush3.bf16.msra.mxu0 %v2188_v1 }
 0xb15   :  { %2193 = vmatprep.subr.bf16.mxu0 %v2192_v4 }
 0xb18   :  { %2195 = vmatpush3.bf16.msra.mxu0 %v2192_v4 }
 0xbde   :  { %v2125_v18 = vpop.f32.mrb[14].mxu0 }
 0xbdf   :  { %v1630_v19 = vadd.f32 %v2125_v18, %v1551_v61  ;;  %v1624_v21 = vpop.f32.mrb[15].mxu0 }
 0xbe0   :  { %v1625_v22 = vadd.f32 %v1624_v21, %v1551_v61 }
 0xbe1   :  { %v1634_v23 = vadd.f32 %v1630_v19, %v2409_v7 }
 0xbe2   :  { %v1633_v63 = vadd.f32 %v1625_v22, %v2405_v5  ;;  %v1674_v5 = vld [vmem:[%s2675_s5] sm:$0xff] }
 0xbe3   :  { %v1638_v24 = vsel %vm62_vm0, %v1634_v23, 0.0  ;;  %v2172_v38 = vpack.c.bf16 %v1675_v37, %v1674_v5 }
 0xbe4   :  { %1639 = vadd.xlane.f32.xlu1 %v1638_v24  ;;  %v1635_v27 = vsel %vm62_vm0, %v1633_v63, 0.0 }
 0xbe5   :  { %1636 = vadd.xlane.f32.xlu0 %v1635_v27  ;;  %2173 = vmatprep.subr.bf16.mxu1 %v2172_v38  ;;  %v1786_v27 = vsub.s32 3, %v2440_v20 }
 0xbe6   :  { %2175 = vmatpush3.bf16.msra.mxu1 %v2172_v38 }
 0xbe7   :  { %2177 = vmatprep.subr.bf16.mxu1 %v2176_v39 }
 0xbea   :  { %2179 = vmatpush3.bf16.msra.mxu1 %v2176_v39 }
 0xc71   :  { %v1640_v28 = vpop.xlane.xlu1 %1639 }
 0xc72   :  { %v1643_v29 = vmul.f32 0.03125, %v1640_v28  ;;  %v1637_v30 = vpop.xlane.xlu0 %1636  ;;  %v1787_v28 = vrot.slane %v2588_v17, %v1786_v27 }
 0xc73   :  { %v1642_v31 = vmul.f32 0.03125, %v1637_v30 }
 0xc74   :  { %v1645_v33 = vsub.f32 %v1634_v23, %v1643_v29 }
 0xc75   :  { %v1644_v25 = vsub.f32 %v1633_v63, %v1642_v31 }
 0xc76   :  { %v1647_v36 = vmul.f32 %v1645_v33, %v1645_v33 }
 0xc77   :  { %v1646_v34 = vmul.f32 %v1644_v25, %v1644_v25 }
 0xc78   :  { %v1651_v7 = vsel %vm62_vm0, %v1647_v36, 0.0 }
 0xc79   :  { %v1648_v35 = vsel %vm62_vm0, %v1646_v34, 0.0 }
 0xc7a   :  { %1649 = vadd.xlane.f32.xlu0 %v1648_v35 }
 0xc7e   :  { %1652 = vadd.xlane.f32.xlu0 %v1651_v7 }
 0xd07   :  { %v1650_v40 = vpop.xlane.xlu0 %1649 }
 0xd08   :  { %v1654_v32 = vmul.f32 0.03125, %v1650_v40 }
 0xd0a   :  { %v1656_v41 = vadd.f32 1e-12, %v1654_v32 }
 0xd0b   :  { %v1653_v43 = vpop.xlane.xlu0 %1652 }
 0xd0c   :  { %2248 = vrsqrt.f32 %v1656_v41  ;;  %v1655_v45 = vmul.f32 0.03125, %v1653_v43 }
 0xd0e   :  { %v1657_v12 = vadd.f32 1e-12, %v1655_v45 }
 0xd10   :  { %2250 = vrsqrt.f32 %v1657_v12 }
 0xd16   :  { %v2249_v47 = vpop.eup %2248 }
 0xd17   :  { %v1660_v48 = vmul.f32 %v2249_v47, %v1644_v25  ;;  %v1900_v47 = vsub.s32 4, %v2440_v20 }
 0xd19   :  { %v1666_v50 = vmul.f32 %v1665_v44, %v1660_v48  ;;  %v1906_v48 = vsub.s32 5, %v2440_v20 }
 0xd1a   :  { %v2251_v51 = vpop.eup %2250 }
 0xd1b   :  { %v1661_v52 = vmul.f32 %v2251_v51, %v1645_v33  ;;  %v1672_v53 = vadd.f32 %v1671_v49, %v1666_v50 }
 0xd1d   :  { %v1667_v13 = vmul.f32 %v1665_v44, %v1661_v52  ;;  %2134 = vmatprep.mubr.msk.f32.mxu1 %vm62_vm0, %v1672_v53 }
 0xd1f   :  { %v1673_v54 = vadd.f32 %v1671_v49, %v1667_v13  ;;  %v1901_v49 = vrot.slane %v2588_v17, %v1900_v47 }
 0xd21   :  { %2135 = vmatmul.mubr.msk.f32.vlgmr.msra.gmra.mrb[20].mxu1 %vm62_vm0, %v1673_v54 }
 0xdf4   :  { %v2136_v9 = vpop.f32.mrb[20].mxu1 }
 0xdf5   :  { %v1763_v10 = vadd.f32 %v2136_v9, %v1959_v6  ;;  %v1757_v11 = vpop.f32.mrb[21].mxu1 }
 0xdf6   :  { %v1758_v14 = vadd.f32 %v1959_v6, %v1757_v11 }
 0xdf7   :  { %v1769_v15 = vmul.f32 0.70710677, %v1763_v10  ;;  %v1767_v23 = vmul.f32 0.5, %v1763_v10 }
 0xdf8   :  { %v1768_v16 = vmul.f32 0.70710677, %v1758_v14  ;;  %v1766_v21 = vmul.f32 0.5, %v1758_v14 }
 0xdf9   :  { %2252 = verf.f32 %v1769_v15 }
 0xdfa   :  { %2254 = verf.f32 %v1768_v16 }
 0xe03   :  { %v2253_v61 = vpop.eup %2252 }
 0xe04   :  { %v2255_v18 = vpop.eup %2254  ;;  %v1773_v19 = vadd.f32 1.0, %v2253_v61 }
 0xe05   :  { %v1772_v22 = vadd.f32 1.0, %v2255_v18 }
 0xe06   :  { %v1775_v24 = vmul.f32 %v1773_v19, %v1767_v23 }
 0xe07   :  { %v1774_v63 = vmul.f32 %v1772_v22, %v1766_v21 }
 0xe09   :  { %2153 = vmatprep.mubr.msk.f32.mxu0 %vm1788_vm5, %v1774_v63 }
 0xe0a   :  { %2154 = vmatmul.mubr.msk.f32.vlgmr.msra.gmra.mrb[16].mxu0 %vm1788_vm5, %v1775_v24 }
 0xedd   :  { %v2155_v29 = vpop.f32.mrb[16].mxu0 }
 0xede   :  { %v1867_v30 = vadd.f32 %v2155_v29, %v1787_v28  ;;  %v1861_v31 = vpop.f32.mrb[17].mxu0 }
 0xedf   :  { %v1862_v33 = vadd.f32 %v1861_v31, %v1787_v28 }
 0xee0   :  { %v1871_v25 = vadd.f32 %v1867_v30, %v1673_v54 }
 0xee1   :  { %v1870_v34 = vadd.f32 %v1862_v33, %v1672_v53  ;;  %v1907_v53 = vrot.slane %v2588_v17, %v1906_v48 }
 0xee2   :  { %v1875_v35 = vsel %vm62_vm0, %v1871_v25, 0.0 }
 0xee3   :  { %1876 = vadd.xlane.f32.xlu0 %v1875_v35  ;;  %v1872_v36 = vsel %vm62_vm0, %v1870_v34, 0.0 }
 0xee4   :  { %1873 = vadd.xlane.f32.xlu1 %v1872_v36 }
 0xf70   :  { %v1877_v7 = vpop.xlane.xlu0 %1876 }
 0xf71   :  { %v1879_v5 = vmul.f32 0.03125, %v1877_v7  ;;  %v1874_v37 = vpop.xlane.xlu1 %1873 }
 0xf72   :  { %v1878_v38 = vmul.f32 0.03125, %v1874_v37 }
 0xf73   :  { %v1881_v8 = vsub.f32 %v1871_v25, %v1879_v5 }
 0xf74   :  { %v1880_v26 = vsub.f32 %v1870_v34, %v1878_v38 }
 0xf75   :  { %v1883_v39 = vmul.f32 %v1881_v8, %v1881_v8 }
 0xf76   :  { %v1882_v40 = vmul.f32 %v1880_v26, %v1880_v26 }
 0xf77   :  { %v1887_v32 = vsel %vm62_vm0, %v1883_v39, 0.0 }
 0xf78   :  { %1888 = vadd.xlane.f32.xlu0 %v1887_v32  ;;  %v1884_v41 = vsel %vm62_vm0, %v1882_v40, 0.0 }
 0xf79   :  { %1885 = vadd.xlane.f32.xlu1 %v1884_v41 }
0x1005   :  { %v1889_v43 = vpop.xlane.xlu0 %1888 }
0x1006   :  { %v1891_v45 = vmul.f32 0.03125, %v1889_v43  ;;  %v1886_v12 = vpop.xlane.xlu1 %1885 }
0x1007   :  { %v1890_v42 = vmul.f32 0.03125, %v1886_v12 }
0x1008   :  { %v1893_v46 = vadd.f32 1e-12, %v1891_v45 }
0x1009   :  { %v1892_v44 = vadd.f32 1e-12, %v1890_v42 }
0x100a   :  { %2256 = vrsqrt.f32 %v1893_v46 }
0x100b   :  { %2258 = vrsqrt.f32 %v1892_v44 }
0x1014   :  { %v2257_v50 = vpop.eup %2256 }
0x1015   :  { %v2259_v51 = vpop.eup %2258  ;;  %v1897_v52 = vmul.f32 %v2257_v50, %v1881_v8 }
0x1016   :  { %v1896_v13 = vmul.f32 %v2259_v51, %v1880_v26 }
0x1017   :  { %v1903_v54 = vmul.f32 %v1901_v49, %v1897_v52 }
0x1018   :  { %v1902_v55 = vmul.f32 %v1901_v49, %v1896_v13 }
0x1019   :  { %v1909_v56 = vadd.f32 %v1907_v53, %v1903_v54 }
0x101a   :  { %v1908_v57 = vadd.f32 %v1907_v53, %v1902_v55 }
0x101b   :  { %1911 = vst.msk [vmem:[#allocation5 + $0x8] sm:$0xff] %vm62_vm0, %v1909_v56 }
0x101c   :  { %1910 = vst.msk [vmem:[#allocation5] sm:$0xff] %vm62_vm0, %v1908_v57 }
0x101d   :  { %2293 = shalt.err (!%p2290_p12)
}
0x101e   :  { %s2294_s1 = scalar_lea.hbm %s2679_s9, 256 }
0x101f   :  { %p2295_p13 = scmp.ne.s32.totalorder %s2679_s9, %s2294_s1  ;;  %p2298_p0 = scmp.lt.u32.totalorder %s2294_s1, %s2679_s9 }
0x1021   :  { %p2300_p1 = pnand %p2298_p0, %p2295_p13 }
0x1023   :  { %2303 = shalt.err (!%p2300_p1)
}
0x1024   :  { %1923 = dma.vmem_to_hbm [thread:$0]  %s1918_s7, 256, %s2679_s9, [#allocation4], %s2309_s19, %s2309_s19, %s2310_s20  }
0x1025   :  { %2306 = dma.done.wait [#allocation4], 256  }
0x1026   :  { %2307 = vsyncadd [#allocation4], 4294967040 }
0x1027   :  { %1927 = vsyncpa [#allocation3], 1 }
0x1028   :  { %1928 = vsyncpa [#allocation4], 1 }

</bundles_post_ra>
